<compile_context>
chip_gen: v7x
topology: tpu7x:2x2x1
jax: 0.10.0
libtpu: 0.0.40
codegen_flags: <defaults>
</compile_context>

<pallas_src>
import functools

import numpy as np
import jax
import jax.numpy as jnp
from jax import lax
from jax.experimental import pallas as pl
from jax.experimental.pallas import tpu as pltpu


def _round_up(x, m):
    return (x + m - 1) // m * m


def _choose_tiles(n, d, itemsize, budget_bytes=24 * 1024 * 1024):
    """Pick (n_pad, row_tile, col_tile) under a conservative VMEM budget."""

    def cost(tr, tc):
        streams = 2 * (tr + tc) * d * itemsize   # double-buffered row/col input tiles
        temps = 4 * tr * tc * 4                  # s / exp / mask f32 temporaries
        return streams + temps

    n8 = _round_up(n, 8)
    if n8 <= 512 and cost(n8, n8) <= budget_bytes:
        return n8, n8, n8                        # single-tile fast path (small problems)

    n_pad = _round_up(n, 256)
    tc = min(1024, n_pad)
    tr = min(512, n_pad)
    while tc > 128 and (cost(tr, tc) > budget_bytes or n_pad % tc != 0):
        tc //= 2
    while tr > 128 and (cost(tr, tc) > budget_bytes or n_pad % tr != 0):
        tr //= 2
    return n_pad, tr, tc


def _ntxent_lse_kernel(rep_row_ref, rep_col_ref, lse_ref, m_ref, l_ref, *,
                       row_tile, col_tile):
    i = pl.program_id(0)                 # row-tile index ("parallel")
    j = pl.program_id(1)                 # col-tile index ("arbitrary", innermost)
    n_col = pl.num_programs(1)

    @pl.when(j == 0)
    def _init():
        m_ref[...] = jnp.full_like(m_ref, -jnp.inf)
        l_ref[...] = jnp.zeros_like(l_ref)

    # (tr, tc) logits tile. Inputs are pre-normalized and pre-scaled by sqrt(1/T) in
    # the wrapper, so this is directly cos_sim / temperature. Contract on last dims
    # -> no transpose, MXU fed directly.
    s = lax.dot_general(rep_row_ref[...], rep_col_ref[...],
                        (((1,), (1,)), ((), ())),
                        preferred_element_type=jnp.float32)

    def _accumulate(s_tile):
        m_prev = m_ref[...]
        m_new = jnp.maximum(m_prev, jnp.max(s_tile, axis=-1, keepdims=True))
        l_ref[...] = (l_ref[...] * jnp.exp(m_prev - m_new)
                      + jnp.sum(jnp.exp(s_tile - m_new), axis=-1, keepdims=True))
        m_ref[...] = m_new

    # Only tiles that intersect the global self-similarity diagonal need masking.
    row_lo = i * row_tile
    col_lo = j * col_tile
    has_diag = jnp.logical_and(row_lo < col_lo + col_tile,
                               col_lo < row_lo + row_tile)

    @pl.when(has_diag)
    def _masked():
        gr = lax.broadcasted_iota(jnp.int32, s.shape, 0) + row_lo
        gc = lax.broadcasted_iota(jnp.int32, s.shape, 1) + col_lo
        _accumulate(jnp.where(gr == gc, jnp.float32(-1e30), s))

    @pl.when(jnp.logical_not(has_diag))
    def _plain():
        _accumulate(s)

    @pl.when(j == n_col - 1)
    def _finalize():
        lse_ref[...] = m_ref[...] + jnp.log(l_ref[...])


def ntxent_loss(zis, zjs, temperature, *, eps=1e-8, use_bf16_mxu=False,
                row_tile=None, col_tile=None):
    """Pallas TPU NT-Xent loss. zis, zjs: (B, D). Returns scalar f32."""
    B, D = zis.shape
    assert zjs.shape == (B, D)
    n = 2 * B

    rep = jnp.concatenate([zjs, zis], axis=0).astype(jnp.float32)      # (2B, D)

    # Cosine normalization x / max(||x||, eps), with sqrt(1/T) folded in so that
    # rep_s @ rep_s.T == cos_sim / temperature (applies to positives as well).
    inv_norm = jnp.minimum(lax.rsqrt(jnp.sum(rep * rep, axis=-1, keepdims=True)),
                           jnp.float32(1.0 / eps))
    scale = jnp.float32(np.sqrt(1.0 / float(temperature)))
    rep_s = rep * (inv_norm * scale)

    # Positive logit per row: partner of row r is row (r + B) mod 2B.
    pos = jnp.sum(rep_s * jnp.roll(rep_s, -B, axis=0), axis=-1)        # (2B,)

    rep_in = rep_s.astype(jnp.bfloat16) if use_bf16_mxu else rep_s
    itemsize = 2 if use_bf16_mxu else 4

    if row_tile is not None and col_tile is not None:
        tr, tc = int(row_tile), int(col_tile)
        assert n % tr == 0 and n % tc == 0
        n_pad = n
    else:
        n_pad, tr, tc = _choose_tiles(n, D, itemsize)

    if n_pad > n:
        rep_in = jnp.pad(rep_in, ((0, n_pad - n), (0, 0)))

    kernel = functools.partial(_ntxent_lse_kernel, row_tile=tr, col_tile=tc)

    lse = pl.pallas_call(
        kernel,
        out_shape=jax.ShapeDtypeStruct((n_pad, 1), jnp.float32),
        grid_spec=pltpu.PrefetchScalarGridSpec(
            num_scalar_prefetch=0,
            grid=(n_pad // tr, n_pad // tc),
            in_specs=[
                pl.BlockSpec((tr, D), lambda i, j: (i, 0)),   # row tile of rep
                pl.BlockSpec((tc, D), lambda i, j: (j, 0)),   # col tile of rep
            ],
            out_specs=pl.BlockSpec((tr, 1), lambda i, j: (i, 0)),
            scratch_shapes=[pltpu.VMEM((tr, 1), jnp.float32),   # running max
                            pltpu.VMEM((tr, 1), jnp.float32)],  # running sum
        ),
        compiler_params=pltpu.CompilerParams(
            dimension_semantics=("parallel", "arbitrary"),
            vmem_limit_bytes=48 * 1024 * 1024),
    )(rep_in, rep_in)

    lse = lse[:n, 0]
    if n_pad > n:
        # Each of the (n_pad - n) zero padding rows added exp(0) = 1 to every real
        # row's softmax denominator (and is never on a real row's diagonal); remove
        # that contribution exactly.
        lse = lse + jnp.log1p(-(n_pad - n) * jnp.exp(-lse))

    # CrossEntropyLoss(reduction='sum') with label 0, then / (2B).
    return jnp.sum(lse - pos) * jnp.float32(1.0 / n)


def _ntxent_ref_np(zis, zjs, temperature):
    """NumPy reference mirroring the PyTorch module line-by-line."""
    zis = np.asarray(zis, np.float32)
    zjs = np.asarray(zjs, np.float32)
    rep = np.concatenate([zjs, zis], axis=0)
    normed = rep / np.maximum(np.linalg.norm(rep, axis=-1, keepdims=True), 1e-8)
    sim = normed @ normed.T
    B = zis.shape[0]
    n = 2 * B
    l_pos = np.diag(sim, B)
    r_pos = np.diag(sim, -B)
    positives = np.concatenate([l_pos, r_pos]).reshape(n, 1)
    mask = (1 - (np.eye(n) + np.eye(n, k=B) + np.eye(n, k=-B))).astype(bool)
    negatives = sim[mask].reshape(n, -1)
    logits = np.concatenate([positives, negatives], axis=1) / temperature
    m = logits.max(axis=1, keepdims=True)
    lse = m[:, 0] + np.log(np.exp(logits - m).sum(axis=1))
    loss = np.sum(lse - logits[:, 0])
    return np.float32(loss / n)


if __name__ == "__main__":
    key = jax.random.PRNGKey(0)
    k1, k2, k3, k4, k5, k6 = jax.random.split(key, 6)
    temperature = 0.5

    # Case 1: small batch, single-tile fast path (grid (1, 1)).
    B, D = 4, 32
    zis = jax.random.normal(k1, (B, D), dtype=jnp.float32)
    zjs = jax.random.normal(k2, (B, D), dtype=jnp.float32)
    loss = jax.block_until_ready(ntxent_loss(zis, zjs, temperature))
    ref = _ntxent_ref_np(np.asarray(zis), np.asarray(zjs), temperature)
    np.testing.assert_allclose(np.asarray(loss), ref, rtol=1e-4, atol=1e-4)

    # Case 2: multi-tile online-logsumexp path with diag-branch skipping (grid (2, 2)).
    B2, D2 = 8, 32
    zis2 = jax.random.normal(k3, (B2, D2), dtype=jnp.float32)
    zjs2 = jax.random.normal(k4, (B2, D2), dtype=jnp.float32)
    loss2 = jax.block_until_ready(
        ntxent_loss(zis2, zjs2, temperature, row_tile=8, col_tile=8))
    ref2 = _ntxent_ref_np(np.asarray(zis2), np.asarray(zjs2), temperature)
    np.testing.assert_allclose(np.asarray(loss2), ref2, rtol=1e-4, atol=1e-4)

    # Case 3: unequal row/col tiles (grid (2, 1)).
    loss3 = jax.block_until_ready(
        ntxent_loss(zis2, zjs2, temperature, row_tile=8, col_tile=16))
    np.testing.assert_allclose(np.asarray(loss3), ref2, rtol=1e-4, atol=1e-4)

    # Case 4: batch that forces row padding (2B = 10 -> padded to 16) + log1p fixup.
    B4, D4 = 5, 32
    zis4 = jax.random.normal(k5, (B4, D4), dtype=jnp.float32)
    zjs4 = jax.random.normal(k6, (B4, D4), dtype=jnp.float32)
    loss4 = jax.block_until_ready(ntxent_loss(zis4, zjs4, temperature))
    ref4 = _ntxent_ref_np(np.asarray(zis4), np.asarray(zjs4), temperature)
    np.testing.assert_allclose(np.asarray(loss4), ref4, rtol=1e-4, atol=1e-4)

    # Case 5: bf16 MXU operand path (looser tolerance).
    loss5 = jax.block_until_ready(
        ntxent_loss(zis2, zjs2, temperature, use_bf16_mxu=True))
    np.testing.assert_allclose(np.asarray(loss5), ref2, rtol=5e-2, atol=5e-2)

    print("KERNEL_OK")
</pallas_src>

<mosaic_0001>
module attributes {stable_mosaic.version = 11 : i64} {
  func.func @_ntxent_lse_kernel(%arg0: i32, %arg1: i32, %arg2: memref<8x32xf32, #tpu.memory_space<vmem>>, %arg3: memref<8x32xf32, #tpu.memory_space<vmem>>, %arg4: memref<8x1xf32, #tpu.memory_space<vmem>>, %arg5: memref<8x1xf32, #tpu.memory_space<vmem>>, %arg6: memref<8x1xf32, #tpu.memory_space<vmem>>) attributes {dimension_semantics = [#tpu.dimension_semantics<parallel>, #tpu.dimension_semantics<arbitrary>], iteration_bounds = array<i64: 1, 1>, scalar_prefetch = 0 : i64, scratch_operands = 2 : i64, tpu.core_type = #tpu.core_type<tc>, window_params = [{transform_indices = @transform_0, window_bounds = array<i64: 8, 32>}, {transform_indices = @transform_1, window_bounds = array<i64: 8, 32>}, {transform_indices = @transform_2, window_bounds = array<i64: 8, 1>}]} {
    %c0_i32 = arith.constant 0 : i32
    %0 = arith.cmpi eq, %arg1, %c0_i32 : i32
    %1 = arith.extui %0 : i1 to i32
    %c0_i32_0 = arith.constant 0 : i32
    %2 = arith.cmpi ne, %1, %c0_i32_0 : i32
    scf.if %2 {
      %cst_11 = arith.constant 0xFF800000 : f32
      %21 = vector.broadcast %cst_11 : f32 to vector<8x1xf32>
      %c0_12 = arith.constant 0 : index
      %c0_13 = arith.constant 0 : index
      %22 = vector.load %arg5[%c0_12, %c0_13] : memref<8x1xf32, #tpu.memory_space<vmem>>, vector<8x1xf32>
      tpu.vector_store %arg5[%c0_12, %c0_13], %21 {strides = array<i32>} : memref<8x1xf32, #tpu.memory_space<vmem>>, vector<8x1xf32>,
      %cst_14 = arith.constant 0.000000e+00 : f32
      %23 = vector.broadcast %cst_14 : f32 to vector<8x1xf32>
      %c0_15 = arith.constant 0 : index
      %c0_16 = arith.constant 0 : index
      %24 = vector.load %arg6[%c0_15, %c0_16] : memref<8x1xf32, #tpu.memory_space<vmem>>, vector<8x1xf32>
      tpu.vector_store %arg6[%c0_15, %c0_16], %23 {strides = array<i32>} : memref<8x1xf32, #tpu.memory_space<vmem>>, vector<8x1xf32>,
    } else {
    }
    %c0 = arith.constant 0 : index
    %c0_1 = arith.constant 0 : index
    %3 = vector.load %arg2[%c0, %c0_1] : memref<8x32xf32, #tpu.memory_space<vmem>>, vector<8x32xf32>
    %c0_2 = arith.constant 0 : index
    %c0_3 = arith.constant 0 : index
    %4 = vector.load %arg3[%c0_2, %c0_3] : memref<8x32xf32, #tpu.memory_space<vmem>>, vector<8x32xf32>
    %cst = arith.constant dense<0.000000e+00> : vector<8x8xf32>
    %5 = tpu.matmul %3, %4, %cst {dimension_numbers = #tpu.dot_dimension_numbers<[1], [1], [0], [0], [0, 0, 1, 0], [], []>} : vector<8x32xf32>, vector<8x32xf32>, vector<8x8xf32> -> vector<8x8xf32>
    %c8_i32 = arith.constant 8 : i32
    %6 = arith.muli %arg0, %c8_i32 : i32
    %c8_i32_4 = arith.constant 8 : i32
    %7 = arith.muli %arg1, %c8_i32_4 : i32
    %c8_i32_5 = arith.constant 8 : i32
    %8 = arith.addi %7, %c8_i32_5 : i32
    %9 = arith.cmpi slt, %6, %8 : i32
    %c8_i32_6 = arith.constant 8 : i32
    %10 = arith.addi %6, %c8_i32_6 : i32
    %11 = arith.cmpi slt, %7, %10 : i32
    %12 = arith.andi %9, %11 : i1
    %13 = arith.extui %12 : i1 to i32
    %c0_i32_7 = arith.constant 0 : i32
    %14 = arith.cmpi ne, %13, %c0_i32_7 : i32
    scf.if %14 {
      %21 = tpu.iota {dimensions = array<i32: 0>} : vector<8x8xi32>
      %22 = vector.broadcast %6 : i32 to vector<8x8xi32>
      %23 = arith.addi %21, %22 : vector<8x8xi32>
      %24 = tpu.iota {dimensions = array<i32: 1>} : vector<8x8xi32>
      %25 = vector.broadcast %7 : i32 to vector<8x8xi32>
      %26 = arith.addi %24, %25 : vector<8x8xi32>
      %27 = arith.cmpi eq, %23, %26 : vector<8x8xi32>
      %cst_11 = arith.constant -1.000000e+30 : f32
      %28 = vector.broadcast %cst_11 : f32 to vector<8x8xf32>
      %29 = arith.select %27, %28, %5 : vector<8x8xi1>, vector<8x8xf32>
      %c0_12 = arith.constant 0 : index
      %c0_13 = arith.constant 0 : index
      %30 = vector.load %arg5[%c0_12, %c0_13] : memref<8x1xf32, #tpu.memory_space<vmem>>, vector<8x1xf32>
      %cst_14 = arith.constant dense<0xFF800000> : vector<8xf32>
      %31 = vector.multi_reduction <maximumf>, %29, %cst_14 [1] : vector<8x8xf32> to vector<8xf32>
      %32 = vector.shape_cast %31 : vector<8xf32> to vector<8x1xf32>
      %33 = arith.maximumf %30, %32 : vector<8x1xf32>
      %c0_15 = arith.constant 0 : index
      %c0_16 = arith.constant 0 : index
      %34 = vector.load %arg6[%c0_15, %c0_16] : memref<8x1xf32, #tpu.memory_space<vmem>>, vector<8x1xf32>
      %35 = arith.subf %30, %33 : vector<8x1xf32>
      %36 = math.exp %35 : vector<8x1xf32>
      %37 = arith.mulf %34, %36 : vector<8x1xf32>
      %38 = vector.broadcast %33 : vector<8x1xf32> to vector<8x8xf32>
      %39 = arith.subf %29, %38 : vector<8x8xf32>
      %40 = math.exp %39 : vector<8x8xf32>
      %cst_17 = arith.constant dense<0.000000e+00> : vector<8xf32>
      %41 = vector.multi_reduction <add>, %40, %cst_17 [1] : vector<8x8xf32> to vector<8xf32>
      %42 = vector.shape_cast %41 : vector<8xf32> to vector<8x1xf32>
      %43 = arith.addf %37, %42 : vector<8x1xf32>
      %c0_18 = arith.constant 0 : index
      %c0_19 = arith.constant 0 : index
      %44 = vector.load %arg6[%c0_18, %c0_19] : memref<8x1xf32, #tpu.memory_space<vmem>>, vector<8x1xf32>
      tpu.vector_store %arg6[%c0_18, %c0_19], %43 {strides = array<i32>} : memref<8x1xf32, #tpu.memory_space<vmem>>, vector<8x1xf32>,
      %c0_20 = arith.constant 0 : index
      %c0_21 = arith.constant 0 : index
      %45 = vector.load %arg5[%c0_20, %c0_21] : memref<8x1xf32, #tpu.memory_space<vmem>>, vector<8x1xf32>
      tpu.vector_store %arg5[%c0_20, %c0_21], %33 {strides = array<i32>} : memref<8x1xf32, #tpu.memory_space<vmem>>, vector<8x1xf32>,
    } else {
    }
    %true = arith.constant true
    %15 = arith.xori %12, %true : i1
    %16 = arith.extui %15 : i1 to i32
    %c0_i32_8 = arith.constant 0 : i32
    %17 = arith.cmpi ne, %16, %c0_i32_8 : i32
    scf.if %17 {
      %c0_11 = arith.constant 0 : index
      %c0_12 = arith.constant 0 : index
      %21 = vector.load %arg5[%c0_11, %c0_12] : memref<8x1xf32, #tpu.memory_space<vmem>>, vector<8x1xf32>
      %cst_13 = arith.constant dense<0xFF800000> : vector<8xf32>
      %22 = vector.multi_reduction <maximumf>, %5, %cst_13 [1] : vector<8x8xf32> to vector<8xf32>
      %23 = vector.shape_cast %22 : vector<8xf32> to vector<8x1xf32>
      %24 = arith.maximumf %21, %23 : vector<8x1xf32>
      %c0_14 = arith.constant 0 : index
      %c0_15 = arith.constant 0 : index
      %25 = vector.load %arg6[%c0_14, %c0_15] : memref<8x1xf32, #tpu.memory_space<vmem>>, vector<8x1xf32>
      %26 = arith.subf %21, %24 : vector<8x1xf32>
      %27 = math.exp %26 : vector<8x1xf32>
      %28 = arith.mulf %25, %27 : vector<8x1xf32>
      %29 = vector.broadcast %24 : vector<8x1xf32> to vector<8x8xf32>
      %30 = arith.subf %5, %29 : vector<8x8xf32>
      %31 = math.exp %30 : vector<8x8xf32>
      %cst_16 = arith.constant dense<0.000000e+00> : vector<8xf32>
      %32 = vector.multi_reduction <add>, %31, %cst_16 [1] : vector<8x8xf32> to vector<8xf32>
      %33 = vector.shape_cast %32 : vector<8xf32> to vector<8x1xf32>
      %34 = arith.addf %28, %33 : vector<8x1xf32>
      %c0_17 = arith.constant 0 : index
      %c0_18 = arith.constant 0 : index
      %35 = vector.load %arg6[%c0_17, %c0_18] : memref<8x1xf32, #tpu.memory_space<vmem>>, vector<8x1xf32>
      tpu.vector_store %arg6[%c0_17, %c0_18], %34 {strides = array<i32>} : memref<8x1xf32, #tpu.memory_space<vmem>>, vector<8x1xf32>,
      %c0_19 = arith.constant 0 : index
      %c0_20 = arith.constant 0 : index
      %36 = vector.load %arg5[%c0_19, %c0_20] : memref<8x1xf32, #tpu.memory_space<vmem>>, vector<8x1xf32>
      tpu.vector_store %arg5[%c0_19, %c0_20], %24 {strides = array<i32>} : memref<8x1xf32, #tpu.memory_space<vmem>>, vector<8x1xf32>,
    } else {
    }
    %c0_i32_9 = arith.constant 0 : i32
    %18 = arith.cmpi eq, %arg1, %c0_i32_9 : i32
    %19 = arith.extui %18 : i1 to i32
    %c0_i32_10 = arith.constant 0 : i32
    %20 = arith.cmpi ne, %19, %c0_i32_10 : i32
    scf.if %20 {
      %c0_11 = arith.constant 0 : index
      %c0_12 = arith.constant 0 : index
      %21 = vector.load %arg5[%c0_11, %c0_12] : memref<8x1xf32, #tpu.memory_space<vmem>>, vector<8x1xf32>
      %c0_13 = arith.constant 0 : index
      %c0_14 = arith.constant 0 : index
      %22 = vector.load %arg6[%c0_13, %c0_14] : memref<8x1xf32, #tpu.memory_space<vmem>>, vector<8x1xf32>
      %23 = math.log %22 : vector<8x1xf32>
      %24 = arith.addf %21, %23 : vector<8x1xf32>
      %c0_15 = arith.constant 0 : index
      %c0_16 = arith.constant 0 : index
      %25 = vector.load %arg4[%c0_15, %c0_16] : memref<8x1xf32, #tpu.memory_space<vmem>>, vector<8x1xf32>
      tpu.vector_store %arg4[%c0_15, %c0_16], %24 {strides = array<i32>} : memref<8x1xf32, #tpu.memory_space<vmem>>, vector<8x1xf32>,
    } else {
    }
    return
  }
  func.func @transform_0(%arg0: i32, %arg1: i32) -> (i32, i32) {
    %c0_i32 = arith.constant 0 : i32
    %c0_i32_0 = arith.constant 0 : i32
    return %arg0, %c0_i32 : i32, i32
  }
  func.func @transform_1(%arg0: i32, %arg1: i32) -> (i32, i32) {
    %c0_i32 = arith.constant 0 : i32
    %c0_i32_0 = arith.constant 0 : i32
    return %arg1, %c0_i32 : i32, i32
  }
  func.func @transform_2(%arg0: i32, %arg1: i32) -> (i32, i32) {
    %c0_i32 = arith.constant 0 : i32
    %c0_i32_0 = arith.constant 0 : i32
    return %arg0, %c0_i32 : i32, i32
  }
}

</mosaic_0001>

<bundles_post_ra>
// kernel: tpu_custom_call.1
= control target key start
LH: loop header
LB: loop body
LE: loop exit
PB: predicated region body
PF: predicated region fallthrough
CT: control target
= control target key end

     0   :  { %7 = vsyncpa [#allocation5], 0  ;;  %s337_s0 = inlined_call_operand.hbm [shape: f32[8,32], index: 0, kind: input, shape index: {}]   ;;  %s338_s1 = inlined_call_operand.hbm [shape: f32[8,32], index: 1, kind: input, shape index: {}]   ;;  %s339_s2 = inlined_call_operand.vmem [shape: f32[8,1], index: 2, kind: output, shape index: {}]  }
   0x1   :  { %8 = vsyncpa [#allocation7], 0  ;;  %s282_s9 = smov [#allocation4]   ;;  %s283_s11 = smov [#allocation6]  }
   0x2   :  { %s15_s10 = sshll.u32 %s282_s9, 4  ;;  %s25_s12 = sshll.u32 %s283_s11, 4  ;;  %s16_s10 = int_to_ptr.vmem [resolvable:$true] %s15_s10  ;;  %s26_s12 = int_to_ptr.vmem [resolvable:$true] %s25_s12 }
   0x3   :  { %s234_s15 = scalar_lea.hbm %s337_s0, 128 }
   0x4   :  { %p235_p0 = scmp.ne.s32.totalorder %s337_s0, %s234_s15  ;;  %p238_p1 = scmp.lt.u32.totalorder %s234_s15, %s337_s0 }
   0x6   :  { %p240_p2 = pnand %p238_p1, %p235_p0 }
   0x8   :  { %243 = shalt.err (!%p240_p2)
}
   0x9   :  { %s244_s20 = scalar_lea.vmem %s16_s10, 128  ;;  %p249_p4 = scmp.lt.s32.totalorder %s16_s10, %s16_s10 }
   0xa   :  { %p245_p3 = scmp.ne.s32.totalorder %s16_s10, %s244_s20  ;;  %p250_p5 = scmp.lt.s32.totalorder %s244_s20, %s244_s20 }
   0xc   :  { %p251_p6 = por %p250_p5, %p249_p4 }
   0xe   :  { %p252_p7 = pnand %p251_p6, %p245_p3 }
  0x10   :  { %255 = shalt.err (!%p252_p7)
}
  0x11   :  { %18 = dma.hbm_to_vmem [thread:$0]  %s337_s0, 128, %s16_s10, [#allocation5]  }
  0x12   :  { %s256_s25 = scalar_lea.hbm %s338_s1, 128 }
  0x13   :  { %p257_p8 = scmp.ne.s32.totalorder %s338_s1, %s256_s25  ;;  %p260_p9 = scmp.lt.u32.totalorder %s256_s25, %s338_s1 }
  0x15   :  { %p262_p10 = pnand %p260_p9, %p257_p8 }
  0x17   :  { %265 = shalt.err (!%p262_p10)
}
  0x18   :  { %s266_s30 = scalar_lea.vmem %s26_s12, 128  ;;  %p271_p12 = scmp.lt.s32.totalorder %s26_s12, %s26_s12 }
  0x19   :  { %p267_p11 = scmp.ne.s32.totalorder %s26_s12, %s266_s30  ;;  %p272_p13 = scmp.lt.s32.totalorder %s266_s30, %s266_s30 }
  0x1b   :  { %p273_p0 = por %p272_p13, %p271_p12 }
  0x1d   :  { %p274_p1 = pnand %p273_p0, %p267_p11 }
  0x1f   :  { %277 = shalt.err (!%p274_p1)
}
  0x20   :  { %28 = dma.hbm_to_vmem [thread:$0]  %s338_s1, 128, %s26_s12, [#allocation7]  }
  0x21   :  { %278 = dma.done.wait [#allocation5], 128  }
  0x22   :  { %279 = vsyncadd [#allocation5], 4294967168 }
  0x23   :  { %280 = dma.done.wait [#allocation7], 128  }
  0x24   :  { %281 = vsyncadd [#allocation7], 4294967168  ;;  %vm39_vm0 = vcmask 7168   ;;  %v284_v0 = vmov 0.0   ;;  %vm285_vm1 = vmmov 0   ;;  %vm44_vm2 = vcmask 261120  }
  0x25   :  { %41 = vst.msk [vmem:[#allocation3] sm:$0xff] %vm39_vm0, %v284_v0  ;;  %216 = vmatprep.subr.mxu0 %v284_v0  ;;  %218 = vmatprep.mubr.msk.f32.mxu0 %vm285_vm1, %v284_v0  ;;  %v43_v1 = vld [vmem:[#allocation6] sm:$0xff]  ;;  %v42_v2 = vld [vmem:[#allocation4] sm:$0xff]  ;;  %v286_v3 = vmov -inf   ;;  %v131_v4 = vlaneseq  ;;  %vm142_vm4 = vcmask 64512   ;;  %v287_v11 = vmov 0  }
  0x26   :  { %217 = vmatpush3.xpose.msk.msra.mxu0 %vm44_vm2, %v43_v1  ;;  %40 = vst.msk [vmem:[#allocation2] sm:$0xff] %vm39_vm0, %v286_v3  ;;  %227 = vset.pattern.permute.xlu0 %v287_v11 }
  0x27   :  { %v132_v5 = vshrl.u32 %v131_v4, 7  ;;  %v136_v6 = vand.u32 127, %v131_v4 }
  0x29   :  { %219 = vmatmul.mubr.msk.f32.vlgmr.msra.gmra.mrb[0].mxu0 %vm44_vm2, %v42_v2  ;;  %vm139_vm3 = vcmp.eq.s32.totalorder %v132_v5, %v136_v6 }
  0x2c   :  { %v147_v23 = vld [vmem:[#allocation3] sm:$0xff] }
  0x2d   :  { %v141_v12 = vld [vmem:[#allocation2] sm:$0xff] }
  0xfc   :  { %v117_v7 = vpop.f32.mrb[0].mxu0 }
  0xfd   :  { %v140_v8 = vsel %vm139_vm3, -1e+30, %v117_v7  ;;  %v220_v9 = vpop.f32.mrb[1].mxu0 }
  0xfe   :  { %v143_v10 = vsel %vm142_vm4, %v140_v8, -inf }
  0xff   :  { %144 = vmax.xlane.f32.xlu0 %v143_v10 }
 0x18c   :  { %v145_v13 = vpop.xlane.xlu0 %144 }
 0x18d   :  { %v146_v14 = vmax.f32 %v141_v12, %v145_v13 }
 0x18f   :  { %v148_v15 = vsub.f32 %v141_v12, %v146_v14  ;;  %166 = vst.msk [vmem:[#allocation2] sm:$0xff] %vm39_vm0, %v146_v14  ;;  %154 = vperm.xlu0 %227, %v146_v14  }
 0x191   :  { %v149_v21 = vmul.f32 1.442695, %v148_v15 }
 0x196   :  { %v199_v30 = vld [vmem:[#allocation2] sm:$0xff] }
 0x20e   :  { %v155_v16 = vpop.permute.xlu0 %154 }
 0x20f   :  { %v157_v17 = vsub.f32 %v140_v8, %v155_v16 }
 0x211   :  { %v158_v18 = vmul.f32 1.442695, %v157_v17 }
 0x213   :  { %228 = vpow2.f32 %v158_v18 }
 0x214   :  { %230 = vpow2.f32 %v149_v21 }
 0x21d   :  { %v229_v19 = vpop.eup %228 }
 0x21e   :  { %v160_v20 = vsel %vm142_vm4, %v229_v19, 0.0  ;;  %v231_v22 = vpop.eup %230 }
 0x21f   :  { %161 = vadd.xlane.f32.xlu1 %v160_v20  ;;  %v151_v24 = vmul.f32 %v231_v22, %v147_v23 }
 0x2ac   :  { %v162_v25 = vpop.xlane.xlu1 %161 }
 0x2ad   :  { %v163_v26 = vadd.f32 %v162_v25, %v151_v24 }
 0x2af   :  { %165 = vst.msk [vmem:[#allocation3] sm:$0xff] %vm39_vm0, %v163_v26 }
 0x2b6   :  { %v200_v27 = vld [vmem:[#allocation3] sm:$0xff] }
 0x2b7   :  { %232 = vlog2.f32 %v200_v27 }
 0x2c1   :  { %v233_v28 = vpop.eup %232 }
 0x2c2   :  { %v202_v29 = vmul.f32 0.6931472, %v233_v28 }
 0x2c4   :  { %v203_v31 = vadd.f32 %v202_v29, %v199_v30 }
 0x2c6   :  { %205 = vst.msk [vmem:[%s339_s2] sm:$0xff] %vm39_vm0, %v203_v31 }
 0x2c7   :  { %210 = vsyncpa [#allocation5], 1 }
 0x2c8   :  { %211 = vsyncpa [#allocation7], 1 }

</bundles_post_ra>
